<compile_context>
chip_gen: v7x
topology: tpu7x:2x2x1
jax: 0.10.0
libtpu: 0.0.40
codegen_flags: <defaults>
</compile_context>

<pallas_src>
import functools

import jax
import jax.numpy as jnp
from jax.experimental import pallas as pl
from jax.experimental.pallas import tpu as pltpu


def _round_up(a, m):
    return (a + m - 1) // m * m


def _agent_kernel(x_ref, w_ref, b_ref, out_ref, *, num_obs, hp, r1):
    """Fused actor+critic 3-layer MLP on one batch tile.

    w_ref rows: [0, num_obs)          -> layer-1 weight  [num_obs, hp]
                [r1, r1+hp)           -> layer-2 weight  [hp, hp] (block-diag)
                [r1+hp, r1+2*hp)      -> layer-3 weight  [hp, hp] (heads, padded)
    b_ref: [3, hp] f32, one bias row per layer.
    out_ref: lane-dense (tm, hp) slab; logits in lanes [0, A), value in lane A.
    """
    w_dt = w_ref.dtype
    x = x_ref[...]

    # Layer 1: fused actor/critic input layers.
    h = jnp.dot(x, w_ref[0:num_obs, :], preferred_element_type=jnp.float32)
    h = jnp.maximum(h + b_ref[0:1, :], 0.0)

    # Layer 2: block-diagonal fused fc1.
    h = h.astype(w_dt)
    h = jnp.dot(h, w_ref[r1:r1 + hp, :], preferred_element_type=jnp.float32)
    h = jnp.maximum(h + b_ref[1:2, :], 0.0)

    # Layer 3: fused output heads (lane-padded to hp wide -> unmasked stores).
    h = h.astype(w_dt)
    out = jnp.dot(h, w_ref[r1 + hp:r1 + 2 * hp, :],
                  preferred_element_type=jnp.float32)
    out_ref[...] = (out + b_ref[2:3, :]).astype(out_ref.dtype)


def pack_agent_params(p, num_obs, num_actions, num_hidden,
                      compute_dtype=jnp.float32):
    """Pack the 12 per-layer params into one weight slab + one bias slab."""
    H, A = num_hidden, num_actions
    hp = max(128, _round_up(2 * H, 128))      # lane-dense fused width
    r1 = _round_up(num_obs, 8)                # sublane-aligned start of layer 2
    rows = r1 + 2 * hp

    w = jnp.zeros((rows, hp), jnp.float32)
    # layer 1: concat(actor_in, critic_in) along the output axis
    w = w.at[:num_obs, :H].set(p["actor_w_in"])
    w = w.at[:num_obs, H:2 * H].set(p["critic_w_in"])
    # layer 2: block-diagonal
    w = w.at[r1:r1 + H, :H].set(p["actor_w_fc"])
    w = w.at[r1 + H:r1 + 2 * H, H:2 * H].set(p["critic_w_fc"])
    # layer 3: actor head -> lanes [0, A), critic head -> lane A
    w = w.at[r1 + hp:r1 + hp + H, :A].set(p["actor_w_out"])
    w = w.at[r1 + hp + H:r1 + hp + 2 * H, A:A + 1].set(p["critic_w_out"])

    b = jnp.zeros((3, hp), jnp.float32)
    b = b.at[0, :H].set(p["actor_b_in"][0])
    b = b.at[0, H:2 * H].set(p["critic_b_in"][0])
    b = b.at[1, :H].set(p["actor_b_fc"][0])
    b = b.at[1, H:2 * H].set(p["critic_b_fc"][0])
    b = b.at[2, :A].set(p["actor_b_out"][0])
    b = b.at[2, A:A + 1].set(p["critic_b_out"][0])

    # Weights may be bf16 (MXU-native on v6e/v7x); biases stay f32 so the
    # bias-add / ReLU path remains f32 (friendly to v5e's f32-only VPU).
    return w.astype(compute_dtype), b


def agent_forward(x, w_packed, b_packed, *, num_actions, tile_batch=None):
    """Run the fused Agent forward pass as a single Pallas kernel."""
    B, num_obs = x.shape
    hp = w_packed.shape[1]
    r1 = _round_up(num_obs, 8)
    assert w_packed.shape[0] == r1 + 2 * hp, "weight slab layout mismatch"

    # Batch tile: big enough to amortize per-step overhead, multiple of 8.
    tm = tile_batch if tile_batch is not None else min(1024, _round_up(B, 8))
    tm = _round_up(tm, 8)
    b_pad = _round_up(B, tm)

    x = x.astype(w_packed.dtype)
    if b_pad != B:
        x = jnp.pad(x, ((0, b_pad - B), (0, 0)))
    grid = (b_pad // tm,)

    kernel = functools.partial(_agent_kernel, num_obs=num_obs, hp=hp, r1=r1)

    out = pl.pallas_call(
        kernel,
        grid=grid,
        in_specs=[
            pl.BlockSpec((tm, num_obs), lambda i: (i, 0)),       # x tile
            pl.BlockSpec(w_packed.shape, lambda i: (0, 0)),      # packed weights
            pl.BlockSpec(b_packed.shape, lambda i: (0, 0)),      # packed biases
        ],
        out_specs=pl.BlockSpec((tm, hp), lambda i: (i, 0)),      # lane-dense slab
        out_shape=jax.ShapeDtypeStruct((b_pad, hp), jnp.float32),
        compiler_params=pltpu.CompilerParams(
            dimension_semantics=("parallel",),
        ),
    )(x, w_packed, b_packed)

    logits = out[:B, :num_actions]
    value = out[:B, num_actions:num_actions + 1]
    return logits, value


def init_agent_params(key, num_obs, num_actions, num_hidden):
    """PyTorch-style (uniform +-1/sqrt(fan_in)) Linear init.

    Weights stored pre-transposed [in_features, out_features]; biases [1, out].
    """
    def linear(k, fan_in, fan_out):
        kw, kb = jax.random.split(k)
        bound = 1.0 / jnp.sqrt(jnp.float32(fan_in))
        w = jax.random.uniform(kw, (fan_in, fan_out), jnp.float32, -bound, bound)
        b = jax.random.uniform(kb, (1, fan_out), jnp.float32, -bound, bound)
        return w, b

    keys = jax.random.split(key, 6)
    a_w_in, a_b_in = linear(keys[0], num_obs, num_hidden)
    a_w_fc, a_b_fc = linear(keys[1], num_hidden, num_hidden)
    a_w_out, a_b_out = linear(keys[2], num_hidden, num_actions)
    c_w_in, c_b_in = linear(keys[3], num_obs, num_hidden)
    c_w_fc, c_b_fc = linear(keys[4], num_hidden, num_hidden)
    c_w_out, c_b_out = linear(keys[5], num_hidden, 1)
    return dict(
        actor_w_in=a_w_in, actor_b_in=a_b_in,
        actor_w_fc=a_w_fc, actor_b_fc=a_b_fc,
        actor_w_out=a_w_out, actor_b_out=a_b_out,
        critic_w_in=c_w_in, critic_b_in=c_b_in,
        critic_w_fc=c_w_fc, critic_b_fc=c_b_fc,
        critic_w_out=c_w_out, critic_b_out=c_b_out,
    )


def agent_forward_ref(x, p):
    """Pure-JAX reference for correctness checking."""
    y = jax.nn.relu(x @ p["actor_w_in"] + p["actor_b_in"])
    y = jax.nn.relu(y @ p["actor_w_fc"] + p["actor_b_fc"])
    logits = y @ p["actor_w_out"] + p["actor_b_out"]
    z = jax.nn.relu(x @ p["critic_w_in"] + p["critic_b_in"])
    z = jax.nn.relu(z @ p["critic_w_fc"] + p["critic_b_fc"])
    value = z @ p["critic_w_out"] + p["critic_b_out"]
    return logits, value


if __name__ == "__main__":
    numObs, numActions, numHidden = 16, 4, 32
    batch = 8

    key = jax.random.PRNGKey(0)
    k_params, k_x, k_x2 = jax.random.split(key, 3)
    params = init_agent_params(k_params, numObs, numActions, numHidden)
    x = jax.random.normal(k_x, (batch, numObs), jnp.float32)

    # --- f32 path (exact check vs reference) ---
    w32, b32 = pack_agent_params(params, numObs, numActions, numHidden,
                                 compute_dtype=jnp.float32)
    logits, value = agent_forward(x, w32, b32, num_actions=numActions)
    jax.block_until_ready((logits, value))
    logits_ref, value_ref = agent_forward_ref(x, params)
    assert logits.shape == (batch, numActions)
    assert value.shape == (batch, 1)
    assert jnp.allclose(logits, logits_ref, atol=1e-5, rtol=1e-5)
    assert jnp.allclose(value, value_ref, atol=1e-5, rtol=1e-5)

    # --- bf16 matmul path (v6e/v7x fast path), ragged batch + explicit tile ---
    x2 = jax.random.normal(k_x2, (20, numObs), jnp.float32)
    wbf, bbf = pack_agent_params(params, numObs, numActions, numHidden,
                                 compute_dtype=jnp.bfloat16)
    logits2, value2 = agent_forward(x2, wbf, bbf, num_actions=numActions,
                                    tile_batch=8)
    jax.block_until_ready((logits2, value2))
    logits2_ref, value2_ref = agent_forward_ref(x2, params)
    assert logits2.shape == (20, numActions)
    assert value2.shape == (20, 1)
    assert jnp.allclose(logits2, logits2_ref, atol=1e-1, rtol=1e-1)
    assert jnp.allclose(value2, value2_ref, atol=1e-1, rtol=1e-1)

    print("KERNEL_OK")
</pallas_src>

<mosaic_0001>
module attributes {stable_mosaic.version = 11 : i64} {
  func.func @_agent_kernel(%arg0: i32, %arg1: memref<8x16xf32, #tpu.memory_space<vmem>>, %arg2: memref<272x128xf32, #tpu.memory_space<vmem>>, %arg3: memref<3x128xf32, #tpu.memory_space<vmem>>, %arg4: memref<8x128xf32, #tpu.memory_space<vmem>>) attributes {dimension_semantics = [#tpu.dimension_semantics<parallel>], iteration_bounds = array<i64: 1>, scalar_prefetch = 0 : i64, scratch_operands = 0 : i64, tpu.core_type = #tpu.core_type<tc>, window_params = [{transform_indices = @transform_0, window_bounds = array<i64: 8, 16>}, {pipeline_mode = #tpu.pipeline_mode<synchronous>, transform_indices = @transform_1, window_bounds = array<i64: 272, 128>}, {pipeline_mode = #tpu.pipeline_mode<synchronous>, transform_indices = @transform_2, window_bounds = array<i64: 3, 128>}, {transform_indices = @transform_3, window_bounds = array<i64: 8, 128>}]} {
    %c0 = arith.constant 0 : index
    %c0_0 = arith.constant 0 : index
    %0 = vector.load %arg1[%c0, %c0_0] : memref<8x16xf32, #tpu.memory_space<vmem>>, vector<8x16xf32>
    %c0_1 = arith.constant 0 : index
    %c0_2 = arith.constant 0 : index
    %1 = vector.load %arg2[%c0_1, %c0_2] : memref<272x128xf32, #tpu.memory_space<vmem>>, vector<16x128xf32>
    %cst = arith.constant dense<0.000000e+00> : vector<8x128xf32>
    %2 = tpu.matmul %0, %1, %cst {dimension_numbers = #tpu.dot_dimension_numbers<[1], [0], [0], [1], [0, 0, 1, 1], [], []>} : vector<8x16xf32>, vector<16x128xf32>, vector<8x128xf32> -> vector<8x128xf32>
    %c0_3 = arith.constant 0 : index
    %c0_4 = arith.constant 0 : index
    %3 = vector.load %arg3[%c0_3, %c0_4] : memref<3x128xf32, #tpu.memory_space<vmem>>, vector<1x128xf32>
    %4 = vector.broadcast %3 : vector<1x128xf32> to vector<8x128xf32>
    %5 = arith.addf %2, %4 : vector<8x128xf32>
    %cst_5 = arith.constant 0.000000e+00 : f32
    %6 = vector.broadcast %cst_5 : f32 to vector<8x128xf32>
    %7 = arith.maximumf %5, %6 : vector<8x128xf32>
    %c16 = arith.constant 16 : index
    %c0_6 = arith.constant 0 : index
    %8 = vector.load %arg2[%c16, %c0_6] : memref<272x128xf32, #tpu.memory_space<vmem>>, vector<128x128xf32>
    %cst_7 = arith.constant dense<0.000000e+00> : vector<8x128xf32>
    %9 = tpu.matmul %7, %8, %cst_7 {dimension_numbers = #tpu.dot_dimension_numbers<[1], [0], [0], [1], [0, 0, 1, 1], [], []>} : vector<8x128xf32>, vector<128x128xf32>, vector<8x128xf32> -> vector<8x128xf32>
    %c1 = arith.constant 1 : index
    %c0_8 = arith.constant 0 : index
    %10 = vector.load %arg3[%c1, %c0_8] : memref<3x128xf32, #tpu.memory_space<vmem>>, vector<1x128xf32>
    %11 = vector.broadcast %10 : vector<1x128xf32> to vector<8x128xf32>
    %12 = arith.addf %9, %11 : vector<8x128xf32>
    %cst_9 = arith.constant 0.000000e+00 : f32
    %13 = vector.broadcast %cst_9 : f32 to vector<8x128xf32>
    %14 = arith.maximumf %12, %13 : vector<8x128xf32>
    %c144 = arith.constant 144 : index
    %c0_10 = arith.constant 0 : index
    %15 = vector.load %arg2[%c144, %c0_10] : memref<272x128xf32, #tpu.memory_space<vmem>>, vector<128x128xf32>
    %cst_11 = arith.constant dense<0.000000e+00> : vector<8x128xf32>
    %16 = tpu.matmul %14, %15, %cst_11 {dimension_numbers = #tpu.dot_dimension_numbers<[1], [0], [0], [1], [0, 0, 1, 1], [], []>} : vector<8x128xf32>, vector<128x128xf32>, vector<8x128xf32> -> vector<8x128xf32>
    %c2 = arith.constant 2 : index
    %c0_12 = arith.constant 0 : index
    %17 = vector.load %arg3[%c2, %c0_12] : memref<3x128xf32, #tpu.memory_space<vmem>>, vector<1x128xf32>
    %18 = vector.broadcast %17 : vector<1x128xf32> to vector<8x128xf32>
    %19 = arith.addf %16, %18 : vector<8x128xf32>
    %c0_13 = arith.constant 0 : index
    %c0_14 = arith.constant 0 : index
    %20 = vector.load %arg4[%c0_13, %c0_14] : memref<8x128xf32, #tpu.memory_space<vmem>>, vector<8x128xf32>
    tpu.vector_store %arg4[%c0_13, %c0_14], %19 {strides = array<i32>} : memref<8x128xf32, #tpu.memory_space<vmem>>, vector<8x128xf32>,
    return
  }
  func.func @transform_0(%arg0: i32) -> (i32, i32) {
    %c0_i32 = arith.constant 0 : i32
    %c0_i32_0 = arith.constant 0 : i32
    return %arg0, %c0_i32 : i32, i32
  }
  func.func @transform_1(%arg0: i32) -> (i32, i32) {
    %c0_i32 = arith.constant 0 : i32
    %c0_i32_0 = arith.constant 0 : i32
    %c0_i32_1 = arith.constant 0 : i32
    return %c0_i32, %c0_i32_0 : i32, i32
  }
  func.func @transform_2(%arg0: i32) -> (i32, i32) {
    %c0_i32 = arith.constant 0 : i32
    %c0_i32_0 = arith.constant 0 : i32
    %c0_i32_1 = arith.constant 0 : i32
    return %c0_i32, %c0_i32_0 : i32, i32
  }
  func.func @transform_3(%arg0: i32) -> (i32, i32) {
    %c0_i32 = arith.constant 0 : i32
    %c0_i32_0 = arith.constant 0 : i32
    return %arg0, %c0_i32 : i32, i32
  }
}

</mosaic_0001>

<bundles_post_ra>
// kernel: tpu_custom_call.1
= control target key start
LH: loop header
LB: loop body
LE: loop exit
PB: predicated region body
PF: predicated region fallthrough
CT: control target
= control target key end

     0   :  { %8 = vsyncpa [#allocation3], 0  ;;  %s673_s0 = inlined_call_operand.hbm [shape: f32[8,16], index: 0, kind: input, shape index: {}]   ;;  %s674_s1 = inlined_call_operand.hbm [shape: f32[272,128], index: 1, kind: input, shape index: {}]   ;;  %s675_s2 = inlined_call_operand.vmem [shape: f32[3,128], index: 2, kind: input, shape index: {}]   ;;  %s676_s3 = inlined_call_operand.hbm [shape: f32[8,128], index: 3, kind: output, shape index: {}]  }
   0x1   :  { %9 = vsyncpa [#allocation6], 0 }
   0x2   :  { %10 = vsyncpa [#allocation4], 0  ;;  %s573_s12 = smov [#allocation2]   ;;  %s574_s14 = smov [#allocation5]  }
   0x3   :  { %s17_s13 = sshll.u32 %s573_s12, 4  ;;  %s26_s15 = sshll.u32 %s574_s14, 4  ;;  %s18_s13 = int_to_ptr.vmem [resolvable:$true] %s17_s13  ;;  %s601_s15 = int_to_ptr.vmem [resolvable:$true] %s26_s15 }
   0x4   :  { %s501_s18 = scalar_lea.hbm %s673_s0, 128 }
   0x5   :  { %p502_p0 = scmp.ne.s32.totalorder %s673_s0, %s501_s18  ;;  %p505_p1 = scmp.lt.u32.totalorder %s501_s18, %s673_s0 }
   0x7   :  { %p507_p2 = pnand %p505_p1, %p502_p0 }
   0x9   :  { %510 = shalt.err (!%p507_p2)
}
   0xa   :  { %s511_s23 = scalar_lea.vmem %s18_s13, 128  ;;  %p516_p4 = scmp.lt.s32.totalorder %s18_s13, %s18_s13 }
   0xb   :  { %p512_p3 = scmp.ne.s32.totalorder %s18_s13, %s511_s23  ;;  %p517_p5 = scmp.lt.s32.totalorder %s511_s23, %s511_s23 }
   0xd   :  { %p518_p6 = por %p517_p5, %p516_p4 }
   0xf   :  { %p519_p7 = pnand %p518_p6, %p512_p3 }
  0x11   :  { %522 = shalt.err (!%p519_p7)
}
  0x12   :  { %20 = dma.hbm_to_vmem [thread:$0]  %s673_s0, 128, %s18_s13, [#allocation3]  }
  0x13   :  { %s523_s28 = scalar_lea.hbm %s674_s1, 4352 }
  0x14   :  { %p524_p8 = scmp.ne.s32.totalorder %s674_s1, %s523_s28  ;;  %p527_p9 = scmp.lt.u32.totalorder %s523_s28, %s674_s1 }
  0x16   :  { %p529_p10 = pnand %p527_p9, %p524_p8 }
  0x18   :  { %532 = shalt.err (!%p529_p10)
}
  0x19   :  { %s533_s6 = scalar_lea.vmem %s601_s15, 4352  ;;  %p538_p12 = scmp.lt.s32.totalorder %s601_s15, %s601_s15 }
  0x1a   :  { %p534_p11 = scmp.ne.s32.totalorder %s601_s15, %s533_s6  ;;  %p539_p13 = scmp.lt.s32.totalorder %s533_s6, %s533_s6 }
  0x1c   :  { %p540_p0 = por %p539_p13, %p538_p12 }
  0x1e   :  { %p541_p1 = pnand %p540_p0, %p534_p11 }
  0x20   :  { %544 = shalt.err (!%p541_p1)
}
  0x21   :  { %s575_s0 = smov 128   ;;  %s576_s7 = smov 8  }
  0x22   :  { %32 = dma.hbm_to_vmem [thread:$0]  %s674_s1, 4352, %s601_s15, [#allocation6], %s575_s0, %s575_s0, %s576_s7  }
  0x23   :  { %567 = dma.done.wait [#allocation3], 128  }
  0x24   :  { %568 = vsyncadd [#allocation3], 4294967168 }
  0x25   :  { %569 = dma.done.wait [#allocation6], 4352  }
  0x26   :  { %570 = vsyncadd [#allocation6], 4294962944  ;;  %v577_v0 = vmov 0.0|0.0   ;;  %vm578_vm0 = vmmov 0   ;;  %v579_v1 = vmov 0.0   ;;  %v42_v2 = vld [vmem:[#allocation5] sm:$0xff] }
  0x27   :  { %442 = vmatprep.subr.bf16.mxu0 %v577_v0  ;;  %369 = vmatprep.mubr.msk.f32.mxu0 %vm578_vm0, %v579_v1  ;;  %v43_v3 = vld [vmem:[#allocation5 + $0x8] sm:$0xff]  ;;  %v124_v5 = vld [vmem:[#allocation5 + $0x10] sm:$0xff]  ;;  %v125_v6 = vld [vmem:[#allocation5 + $0x18] sm:$0xff]  ;;  %vm49_vm1 = vcmask 130048   ;;  %s580_s15 = smov [#allocation7]  }
  0x28   :  { %445 = vmatprep.subr.bf16.mxu1 %v577_v0  ;;  %404 = vmatprep.mubr.msk.f32.mxu1 %vm578_vm0, %v579_v1  ;;  %v443_v4 = vpack.c.bf16 %v43_v3, %v42_v2  ;;  %v126_v7 = vld [vmem:[#allocation5 + $0x20] sm:$0xff]  ;;  %v446_v8 = vpack.c.bf16 %v125_v6, %v124_v5  ;;  %v127_v9 = vld [vmem:[#allocation5 + $0x28] sm:$0xff]  ;;  %v41_v10 = vld [vmem:[#allocation2] sm:$0xff]  ;;  %s314_s16 = sshll.u32 %s580_s15, 4  ;;  %s315_s16 = int_to_ptr.vmem [resolvable:$true] %s314_s16 }
  0x29   :  { %v449_v11 = vpack.c.bf16 %v127_v9, %v126_v7  ;;  %v128_v12 = vld [vmem:[#allocation5 + $0x30] sm:$0xff]  ;;  %v129_v13 = vld [vmem:[#allocation5 + $0x38] sm:$0xff]  ;;  %v130_v15 = vld [vmem:[#allocation5 + $0x40] sm:$0xff]  ;;  %s545_s17 = scalar_lea.vmem %s315_s16, 128  ;;  %p550_p3 = scmp.lt.s32.totalorder %s315_s16, %s315_s16 }
  0x2a   :  { %444 = vmatpush3.bf16.msra.mxu0 %v443_v4  ;;  %447 = vmatpush3.bf16.msra.mxu1 %v446_v8  ;;  %v452_v14 = vpack.c.bf16 %v129_v13, %v128_v12  ;;  %v131_v16 = vld [vmem:[#allocation5 + $0x48] sm:$0xff]  ;;  %v132_v18 = vld [vmem:[#allocation5 + $0x50] sm:$0xff]  ;;  %v133_v19 = vld [vmem:[#allocation5 + $0x58] sm:$0xff]  ;;  %p546_p2 = scmp.ne.s32.totalorder %s315_s16, %s545_s17  ;;  %p551_p4 = scmp.lt.s32.totalorder %s545_s17, %s545_s17 }
  0x2b   :  { %469 = vmatprep.subr.bf16.mxu0 %v577_v0  ;;  %448 = vmatprep.subr.bf16.mxu1 %v577_v0  ;;  %v455_v17 = vpack.c.bf16 %v131_v16, %v130_v15  ;;  %v458_v20 = vpack.c.bf16 %v133_v19, %v132_v18  ;;  %v134_v21 = vld [vmem:[#allocation5 + $0x60] sm:$0xff]  ;;  %v135_v22 = vld [vmem:[#allocation5 + $0x68] sm:$0xff]  ;;  %v136_v24 = vld [vmem:[#allocation5 + $0x70] sm:$0xff] }
  0x2c   :  { %v461_v23 = vpack.c.bf16 %v135_v22, %v134_v21  ;;  %v137_v25 = vld [vmem:[#allocation5 + $0x78] sm:$0xff]  ;;  %v138_v27 = vld [vmem:[#allocation5 + $0x80] sm:$0xff]  ;;  %v139_v28 = vld [vmem:[#allocation5 + $0x88] sm:$0xff]  ;;  %p552_p5 = por %p551_p4, %p550_p3 }
  0x2d   :  { %370 = vmatmul.mubr.msk.f32.vlgmr.msra.gmra.mrb[0].mxu0 %vm49_vm1, %v41_v10  ;;  %v464_v26 = vpack.c.bf16 %v137_v25, %v136_v24  ;;  %v467_v29 = vpack.c.bf16 %v139_v28, %v138_v27  ;;  %v216_v30 = vld [vmem:[#allocation5 + $0x90] sm:$0xff]  ;;  %v217_v31 = vld [vmem:[#allocation5 + $0x98] sm:$0xff]  ;;  %v218_v32 = vld [vmem:[#allocation5 + $0xa0] sm:$0xff] }
  0x2e   :  { %439 = vmatprep.mubr.msk.f32.mxu0 %vm578_vm0, %v579_v1  ;;  %450 = vmatpush3.bf16.msra.mxu1 %v449_v11  ;;  %v470_v33 = vpack.c.bf16 %v217_v31, %v216_v30  ;;  %v219_v34 = vld [vmem:[#allocation5 + $0xa8] sm:$0xff]  ;;  %v220_v36 = vld [vmem:[#allocation5 + $0xb0] sm:$0xff]  ;;  %v221_v37 = vld [vmem:[#allocation5 + $0xb8] sm:$0xff]  ;;  %p553_p6 = pnand %p552_p5, %p546_p2 }
  0x2f   :  { %451 = vmatprep.subr.bf16.mxu1 %v577_v0  ;;  %v473_v35 = vpack.c.bf16 %v219_v34, %v218_v32  ;;  %v476_v38 = vpack.c.bf16 %v221_v37, %v220_v36  ;;  %v222_v39 = vld [vmem:[#allocation5 + $0xc0] sm:$0xff]  ;;  %v223_v40 = vld [vmem:[#allocation5 + $0xc8] sm:$0xff]  ;;  %v224_v42 = vld [vmem:[#allocation5 + $0xd0] sm:$0xff] }
  0x30   :  { %471 = vmatpush3.bf16.msra.mxu0 %v470_v33  ;;  %v479_v41 = vpack.c.bf16 %v223_v40, %v222_v39  ;;  %v225_v43 = vld [vmem:[#allocation5 + $0xd8] sm:$0xff]  ;;  %v226_v45 = vld [vmem:[#allocation5 + $0xe0] sm:$0xff]  ;;  %v227_v46 = vld [vmem:[#allocation5 + $0xe8] sm:$0xff] }
  0x31   :  { %472 = vmatprep.subr.bf16.mxu0 %v577_v0  ;;  %v482_v44 = vpack.c.bf16 %v225_v43, %v224_v42  ;;  %v485_v47 = vpack.c.bf16 %v227_v46, %v226_v45  ;;  %v228_v48 = vld [vmem:[#allocation5 + $0xf0] sm:$0xff]  ;;  %v229_v49 = vld [vmem:[#allocation5 + $0xf8] sm:$0xff]  ;;  %v230_v56 = vld [vmem:[#allocation5 + $0x100] sm:$0xff] }
  0x32   :  { %453 = vmatpush3.bf16.msra.mxu1 %v452_v14  ;;  %v488_v50 = vpack.c.bf16 %v229_v49, %v228_v48  ;;  %v324_v51 = vld [vmem:[%s675_s2] ss:$0 sm:$0xff]  ;;  %v231_v57 = vld [vmem:[#allocation5 + $0x108] sm:$0xff]  ;;  %v326_v59 = vld [vmem:[%s675_s2 + $0x1] ss:$0 sm:$0xff] }
  0x33   :  { %454 = vmatprep.subr.bf16.mxu1 %v577_v0  ;;  %v491_v58 = vpack.c.bf16 %v231_v57, %v230_v56 }
  0x34   :  { %474 = vmatpush3.bf16.msra.mxu0 %v473_v35 }
  0x35   :  { %475 = vmatprep.subr.bf16.mxu0 %v577_v0 }
  0x36   :  { %456 = vmatpush3.bf16.msra.mxu1 %v455_v17 }
  0x37   :  { %457 = vmatprep.subr.bf16.mxu1 %v577_v0 }
  0x38   :  { %477 = vmatpush3.bf16.msra.mxu0 %v476_v38 }
  0x39   :  { %478 = vmatprep.subr.bf16.mxu0 %v577_v0 }
  0x3a   :  { %459 = vmatpush3.bf16.msra.mxu1 %v458_v20 }
  0x3b   :  { %460 = vmatprep.subr.bf16.mxu1 %v577_v0 }
  0x3c   :  { %480 = vmatpush3.bf16.msra.mxu0 %v479_v41 }
  0x3d   :  { %481 = vmatprep.subr.bf16.mxu0 %v577_v0 }
  0x3e   :  { %462 = vmatpush3.bf16.msra.mxu1 %v461_v23 }
  0x3f   :  { %463 = vmatprep.subr.bf16.mxu1 %v577_v0 }
  0x40   :  { %483 = vmatpush3.bf16.msra.mxu0 %v482_v44 }
  0x41   :  { %484 = vmatprep.subr.bf16.mxu0 %v577_v0 }
  0x42   :  { %465 = vmatpush3.bf16.msra.mxu1 %v464_v26 }
  0x43   :  { %466 = vmatprep.subr.bf16.mxu1 %v577_v0 }
  0x44   :  { %486 = vmatpush3.bf16.msra.mxu0 %v485_v47 }
  0x45   :  { %487 = vmatprep.subr.bf16.mxu0 %v577_v0 }
  0x46   :  { %468 = vmatpush3.bf16.msra.mxu1 %v467_v29 }
  0x48   :  { %489 = vmatpush3.bf16.msra.mxu0 %v488_v50 }
  0x49   :  { %490 = vmatprep.subr.bf16.mxu0 %v577_v0  ;;  %v327_v0 = vld [vmem:[%s675_s2 + $0x2] ss:$0 sm:$0xff] }
  0x4c   :  { %492 = vmatpush3.bf16.msra.mxu0 %v491_v58 }
 0x100   :  { %v119_v52 = vpop.f32.mrb[0].mxu0 }
 0x101   :  { %v120_v53 = vadd.f32 %v324_v51, %v119_v52  ;;  %v371_v54 = vpop.f32.mrb[1].mxu0 }
 0x103   :  { %v123_v55 = vmax.f32 %v120_v53, 0.0 }
 0x105   :  { %405 = vmatmul.mubr.f32.vlgmr.msra.gmra.mrb[0].mxu1 %v123_v55 }
 0x1d8   :  { %v211_v60 = vpop.f32.mrb[0].mxu1 }
 0x1d9   :  { %v212_v61 = vadd.f32 %v326_v59, %v211_v60  ;;  %v406_v62 = vpop.f32.mrb[1].mxu1 }
 0x1db   :  { %v215_v63 = vmax.f32 %v212_v61, 0.0 }
 0x1dd   :  { %440 = vmatmul.mubr.f32.vlgmr.msra.gmra.mrb[2].mxu0 %v215_v63 }
 0x2b0   :  { %v303_v1 = vpop.f32.mrb[2].mxu0 }
 0x2b1   :  { %v304_v2 = vadd.f32 %v327_v0, %v303_v1  ;;  %v441_v3 = vpop.f32.mrb[3].mxu0 }
 0x2b3   :  { %307 = vst [vmem:[#allocation7] sm:$0xff] %v304_v2 }
 0x2b4   :  { %556 = shalt.err (!%p553_p6)
}
 0x2b5   :  { %s557_s20 = scalar_lea.hbm %s676_s3, 128 }
 0x2b6   :  { %p558_p7 = scmp.ne.s32.totalorder %s676_s3, %s557_s20  ;;  %p561_p8 = scmp.lt.u32.totalorder %s557_s20, %s676_s3 }
 0x2b8   :  { %p563_p9 = pnand %p561_p8, %p558_p7 }
 0x2ba   :  { %566 = shalt.err (!%p563_p9)
}
 0x2bb   :  { %317 = dma.vmem_to_hbm [thread:$0]  %s315_s16, 128, %s676_s3, [#allocation4]  }
 0x2bc   :  { %571 = dma.done.wait [#allocation4], 128  }
 0x2bd   :  { %572 = vsyncadd [#allocation4], 4294967168 }
 0x2be   :  { %321 = vsyncpa [#allocation3], 1 }
 0x2bf   :  { %322 = vsyncpa [#allocation6], 1 }
 0x2c0   :  { %323 = vsyncpa [#allocation4], 1 }

</bundles_post_ra>
